<compile_context>
chip_gen: v5e
topology: v5e:2x2
jax: 0.10.0
libtpu: 0.0.40
codegen_flags: <defaults>
</compile_context>

<pallas_src>
import functools

import jax
import jax.numpy as jnp
from jax.experimental import pallas as pl
from jax.experimental.pallas import tpu as pltpu


def _perturb_kernel(x_ref, w_ref, b_ref, onehot_ref, noise_ref, o_ref,
                    *, pert_ratio: float):
    # x_ref:      (1, Cin, tile_hw)   lane-dense pixel tile (NCHW kept).
    # w_ref:      (Cout, Cin)         resident 1x1-conv weights.
    # b_ref:      (Cout, 1)           resident bias.
    # onehot_ref: (Cout, 1)           +/-1 at target_idx, 0 elsewhere (sign folded in).
    # noise_ref:  (1, 1, tile_hw)     standard-normal draw per pixel.
    # o_ref:      (1, Cout, tile_hw)  lane-dense output tile.
    x = x_ref[0]                                                  # (Cin, tile_hw)
    logits = jnp.dot(w_ref[...], x,
                     preferred_element_type=jnp.float32) + b_ref[...]
    noise = jnp.abs(noise_ref[0] * jnp.float32(pert_ratio))       # (1, tile_hw)
    # Signed one-hot column * per-pixel noise row -> perturbation only on the
    # target class channel, added in a single VPU FMA.
    o_ref[0] = (logits + onehot_ref[...] * noise).astype(o_ref.dtype)


def single_class_perturbator(x_nchw, w, b, noise_nhw,
                             *, target_idx: int, pert_ratio: float,
                             positive: bool = True, tile_hw: int = 8192):
    """x_nchw: (N, Cin, H, W) f32.  w: (Cout, Cin) 1x1-conv weights (torch layout).
    b: (Cout,).  noise_nhw: (N, H, W) standard-normal draws (scaled in-kernel).
    Returns perturbed logits (N, Cout, H, W)."""
    N, Cin, H, W = x_nchw.shape
    Cout = w.shape[0]
    HW = H * W

    # Free reshapes only (no transposes, no extra HBM passes).
    x3 = x_nchw.reshape(N, Cin, HW)
    noise3 = noise_nhw.reshape(N, 1, HW)
    b2 = b.reshape(Cout, 1)
    sign = jnp.float32(1.0 if positive else -1.0)
    one_hot = jnp.zeros((Cout, 1), jnp.float32).at[target_idx].set(sign)

    # Lane-dense tile along the pixel axis: multiple of 128 or the full extent.
    # Partial last tile handled by cdiv grid + masked boundary writes.
    if HW <= tile_hw:
        t = HW
    else:
        t = max((tile_hw // 128) * 128, 128)
    grid = (N, pl.cdiv(HW, t))

    kernel = functools.partial(_perturb_kernel, pert_ratio=pert_ratio)

    out3 = pl.pallas_call(
        kernel,
        out_shape=jax.ShapeDtypeStruct((N, Cout, HW), jnp.float32),
        grid_spec=pltpu.PrefetchScalarGridSpec(
            num_scalar_prefetch=0,
            grid=grid,
            in_specs=[
                pl.BlockSpec((1, Cin, t), lambda n, j: (n, 0, j)),   # x tile
                pl.BlockSpec((Cout, Cin), lambda n, j: (0, 0)),      # weights (resident)
                pl.BlockSpec((Cout, 1), lambda n, j: (0, 0)),        # bias (resident)
                pl.BlockSpec((Cout, 1), lambda n, j: (0, 0)),        # signed one-hot
                pl.BlockSpec((1, 1, t), lambda n, j: (n, 0, j)),     # noise tile
            ],
            out_specs=pl.BlockSpec((1, Cout, t), lambda n, j: (n, 0, j)),
        ),
        compiler_params=pltpu.CompilerParams(
            dimension_semantics=("parallel", "parallel")),
    )(x3, w, b2, one_hot, noise3)

    return out3.reshape(N, Cout, H, W)


if __name__ == "__main__":
    # Small shapes consistent with a segmentation forward pass.
    N, Cin, H, W = 2, 4, 16, 16
    Cout = 8                 # number of classes predicted by the base model
    target_idx = 3
    pert_ratio = 0.1
    positive = True

    key = jax.random.PRNGKey(0)
    kx, kw, kb, kn = jax.random.split(key, 4)

    x = jax.random.normal(kx, (N, Cin, H, W), dtype=jnp.float32)
    # Synthetic "base model": 1x1-conv segmentation head, torch conv layout (Cout, Cin).
    w = jax.random.normal(kw, (Cout, Cin), dtype=jnp.float32) * 0.1
    b = jax.random.normal(kb, (Cout,), dtype=jnp.float32) * 0.01
    # Standard-normal noise, one draw per pixel (scaled by pert_ratio in-kernel).
    # TODO(synk): could be generated in-kernel with pltpu.prng_seed/stateful_normal
    # to save ~4 B/pixel of HBM read; kept host-side for deterministic checking.
    noise = jax.random.normal(kn, (N, H, W), dtype=jnp.float32)

    out = single_class_perturbator(x, w, b, noise,
                                   target_idx=target_idx,
                                   pert_ratio=pert_ratio,
                                   positive=positive)
    out = jax.block_until_ready(out)

    # Pure-JAX reference (same semantics as the torch module), no transposes.
    ref_logits = jnp.einsum('oc,nchw->nohw', w, x) + b[None, :, None, None]
    noise_img = jnp.abs(noise * pert_ratio)
    ref = ref_logits.at[:, target_idx].add(noise_img if positive else -noise_img)

    assert out.shape == (N, Cout, H, W)
    assert jnp.allclose(out, ref, atol=1e-5), "mismatch vs reference"
    # Non-target channels untouched; target channel strictly increased.
    assert jnp.allclose(out[:, :target_idx], ref_logits[:, :target_idx], atol=1e-5)
    assert bool(jnp.all(out[:, target_idx] >= ref_logits[:, target_idx] - 1e-6))

    # Ragged-tail path: HW not a multiple of the tile; exercises cdiv grid +
    # masked boundary writes, and the negative-noise branch.
    H2, W2 = 17, 15                      # HW = 255, tile = 128 -> partial last tile
    x2 = jax.random.normal(kx, (N, Cin, H2, W2), dtype=jnp.float32)
    n2 = jax.random.normal(kn, (N, H2, W2), dtype=jnp.float32)
    out2 = single_class_perturbator(x2, w, b, n2,
                                    target_idx=target_idx,
                                    pert_ratio=pert_ratio,
                                    positive=False, tile_hw=128)
    out2 = jax.block_until_ready(out2)
    ref2 = (jnp.einsum('oc,nchw->nohw', w, x2) + b[None, :, None, None]
            ).at[:, target_idx].add(-jnp.abs(n2 * pert_ratio))
    assert jnp.allclose(out2, ref2, atol=1e-5), "tail-tile mismatch vs reference"

    print("KERNEL_OK")
</pallas_src>

<mosaic_0001>
module attributes {stable_mosaic.version = 11 : i64} {
  func.func @_perturb_kernel(%arg0: i32, %arg1: i32, %arg2: memref<1x4x256xf32, #tpu.memory_space<vmem>>, %arg3: memref<8x4xf32, #tpu.memory_space<vmem>>, %arg4: memref<8x1xf32, #tpu.memory_space<vmem>>, %arg5: memref<8x1xf32, #tpu.memory_space<vmem>>, %arg6: memref<1x1x256xf32, #tpu.memory_space<vmem>>, %arg7: memref<1x8x256xf32, #tpu.memory_space<vmem>>) attributes {dimension_semantics = [#tpu.dimension_semantics<parallel>, #tpu.dimension_semantics<parallel>], iteration_bounds = array<i64: 2, 1>, scalar_prefetch = 0 : i64, scratch_operands = 0 : i64, tpu.core_type = #tpu.core_type<tc>, window_params = [{transform_indices = @transform_0, window_bounds = array<i64: 1, 4, 256>}, {pipeline_mode = #tpu.pipeline_mode<synchronous>, transform_indices = @transform_1, window_bounds = array<i64: 8, 4>}, {pipeline_mode = #tpu.pipeline_mode<synchronous>, transform_indices = @transform_2, window_bounds = array<i64: 8, 1>}, {pipeline_mode = #tpu.pipeline_mode<synchronous>, transform_indices = @transform_3, window_bounds = array<i64: 8, 1>}, {transform_indices = @transform_4, window_bounds = array<i64: 1, 1, 256>}, {transform_indices = @transform_5, window_bounds = array<i64: 1, 8, 256>}]} {
    %c0 = arith.constant 0 : index
    %c0_0 = arith.constant 0 : index
    %c0_1 = arith.constant 0 : index
    %0 = vector.load %arg2[%c0, %c0_0, %c0_1] : memref<1x4x256xf32, #tpu.memory_space<vmem>>, vector<1x4x256xf32>
    %1 = vector.shape_cast %0 : vector<1x4x256xf32> to vector<4x256xf32>
    %c0_2 = arith.constant 0 : index
    %c0_3 = arith.constant 0 : index
    %2 = vector.load %arg3[%c0_2, %c0_3] : memref<8x4xf32, #tpu.memory_space<vmem>>, vector<8x4xf32>
    %cst = arith.constant dense<0.000000e+00> : vector<8x256xf32>
    %3 = tpu.matmul %2, %1, %cst {dimension_numbers = #tpu.dot_dimension_numbers<[1], [0], [0], [1], [0, 0, 1, 1], [], []>} : vector<8x4xf32>, vector<4x256xf32>, vector<8x256xf32> -> vector<8x256xf32>
    %c0_4 = arith.constant 0 : index
    %c0_5 = arith.constant 0 : index
    %4 = vector.load %arg4[%c0_4, %c0_5] : memref<8x1xf32, #tpu.memory_space<vmem>>, vector<8x1xf32>
    %5 = vector.broadcast %4 : vector<8x1xf32> to vector<8x256xf32>
    %6 = arith.addf %3, %5 : vector<8x256xf32>
    %c0_6 = arith.constant 0 : index
    %c0_7 = arith.constant 0 : index
    %c0_8 = arith.constant 0 : index
    %7 = vector.load %arg6[%c0_6, %c0_7, %c0_8] : memref<1x1x256xf32, #tpu.memory_space<vmem>>, vector<1x1x256xf32>
    %8 = vector.shape_cast %7 : vector<1x1x256xf32> to vector<1x256xf32>
    %cst_9 = arith.constant 1.000000e-01 : f32
    %9 = vector.broadcast %cst_9 : f32 to vector<1x256xf32>
    %10 = arith.mulf %8, %9 : vector<1x256xf32>
    %11 = math.absf %10 : vector<1x256xf32>
    %c0_10 = arith.constant 0 : index
    %c0_11 = arith.constant 0 : index
    %12 = vector.load %arg5[%c0_10, %c0_11] : memref<8x1xf32, #tpu.memory_space<vmem>>, vector<8x1xf32>
    %13 = vector.broadcast %12 : vector<8x1xf32> to vector<8x256xf32>
    %14 = vector.broadcast %11 : vector<1x256xf32> to vector<8x256xf32>
    %15 = arith.mulf %13, %14 : vector<8x256xf32>
    %16 = arith.addf %6, %15 : vector<8x256xf32>
    %c0_12 = arith.constant 0 : index
    %c0_13 = arith.constant 0 : index
    %c0_14 = arith.constant 0 : index
    %17 = vector.load %arg7[%c0_12, %c0_13, %c0_14] : memref<1x8x256xf32, #tpu.memory_space<vmem>>, vector<1x8x256xf32>
    %18 = vector.shape_cast %17 : vector<1x8x256xf32> to vector<8x256xf32>
    %19 = vector.shape_cast %16 : vector<8x256xf32> to vector<1x8x256xf32>
    tpu.vector_store %arg7[%c0_12, %c0_13, %c0_14], %19 {strides = array<i32>} : memref<1x8x256xf32, #tpu.memory_space<vmem>>, vector<1x8x256xf32>,
    return
  }
  func.func @transform_0(%arg0: i32, %arg1: i32) -> (i32, i32, i32) {
    %c0_i32 = arith.constant 0 : i32
    %c0_i32_0 = arith.constant 0 : i32
    return %arg0, %c0_i32, %arg1 : i32, i32, i32
  }
  func.func @transform_1(%arg0: i32, %arg1: i32) -> (i32, i32) {
    %c0_i32 = arith.constant 0 : i32
    %c0_i32_0 = arith.constant 0 : i32
    %c0_i32_1 = arith.constant 0 : i32
    return %c0_i32, %c0_i32_0 : i32, i32
  }
  func.func @transform_2(%arg0: i32, %arg1: i32) -> (i32, i32) {
    %c0_i32 = arith.constant 0 : i32
    %c0_i32_0 = arith.constant 0 : i32
    %c0_i32_1 = arith.constant 0 : i32
    return %c0_i32, %c0_i32_0 : i32, i32
  }
  func.func @transform_3(%arg0: i32, %arg1: i32) -> (i32, i32) {
    %c0_i32 = arith.constant 0 : i32
    %c0_i32_0 = arith.constant 0 : i32
    %c0_i32_1 = arith.constant 0 : i32
    return %c0_i32, %c0_i32_0 : i32, i32
  }
  func.func @transform_4(%arg0: i32, %arg1: i32) -> (i32, i32, i32) {
    %c0_i32 = arith.constant 0 : i32
    %c0_i32_0 = arith.constant 0 : i32
    return %arg0, %c0_i32, %arg1 : i32, i32, i32
  }
  func.func @transform_5(%arg0: i32, %arg1: i32) -> (i32, i32, i32) {
    %c0_i32 = arith.constant 0 : i32
    %c0_i32_0 = arith.constant 0 : i32
    return %arg0, %c0_i32, %arg1 : i32, i32, i32
  }
}

</mosaic_0001>

<bundles_post_ra>
// kernel: tpu_custom_call.1
= control target key start
LH: loop header
LB: loop body
LE: loop exit
PB: predicated region body
PF: predicated region fallthrough
CT: control target
= control target key end

     0   :  { %10 = vsyncpa [#allocation3], 0  ;;  %s775_s0 = inlined_call_operand.vmem [shape: f32[2,4,256], index: 0, kind: input, shape index: {}]   ;;  %s776_s1 = inlined_call_operand.vmem [shape: f32[8,4], index: 1, kind: input, shape index: {}]   ;;  %s777_s2 = inlined_call_operand.vmem [shape: f32[8,1], index: 2, kind: input, shape index: {}]   ;;  %s778_s3 = inlined_call_operand.vmem [shape: f32[8,1], index: 3, kind: input, shape index: {}]   ;;  %s779_s4 = inlined_call_operand.vmem [shape: f32[2,1,256], index: 4, kind: input, shape index: {}]   ;;  %s780_s5 = inlined_call_operand.hbm [shape: f32[2,8,256], index: 5, kind: output, shape index: {}]  }
   0x1   :  { %12 = vsyncpa [#allocation3 + $0x1], 0  ;;  %s666_s18 = smov 0   ;;  %s668_s19 = smov 0  }
   0x2   :  { %s670_s20 = smov 0   ;;  %s672_s21 = smov 0  }
   0x3   :  { %s674_s22 = smov 0   ;;  %s676_s23 = smov 0  }
   0x4 LB: > { %s478_s24 = sadd.s32 4294967295, %s633_s23   ;;  %s479_s25 = sadd.s32 4294967294, %s633_s23   ;;  %s633_s23 = sphi %s676_s23, %s18_s23   ;;  %s629_s22 = sphi %s674_s22, %s787_s22   ;;  %s625_s21 = sphi %s672_s21, %s786_s21   ;;  %s621_s20 = sphi %s670_s20, %s785_s20   ;;  %s617_s19 = sphi %s668_s19, %s784_s19   ;;  %s613_s18 = sphi %s666_s18, %s783_s18  }
   0x5   : > { %s30_s26 = sadd.s32 1, %s629_s22  ;;  %s158_s27 = sadd.s32 1, %s621_s20 }
   0x6   : > { %p32_p0 = scmp.ge.s32.totalorder %s30_s26, 2  ;;  %p168_p1 = scmp.ne.s32.totalorder %s621_s20, %s617_s19 }
   0x7   : > { %p169_p2 = scmp.eq.s32.totalorder %s478_s24, 1  ;;  %p174_p3 = scmp.ne.s32.totalorder %s617_s19, %s613_s18 }
   0x8   : > { %s789_s26 = smov (%p32_p0, %s30_s26), 0  ;;  %p175_p5 = scmp.eq.s32.totalorder %s479_s25, 1 }
   0x9   : > { %p706_p4 = por %p169_p2, %p168_p1  ;;  %s153_s29 = ssub.s32 %s629_s22, %s789_s26 }
   0xa   : > { %p482_p6 = scmp.ge.s32.totalorder %s633_s23, 1  ;;  %p156_p7 = scmp.eq.s32.totalorder %s153_s29, 0 }
   0xb   : > { %p713_p8 = por %p175_p5, %p174_p3  ;;  %p227_p9 = scmp.lt.s32.totalorder %s633_s23, 3 }
   0xc   : > { %s719_s6 = scalar_select %p156_p7, %s621_s20, %s158_s27  }
   0xd   : > { %p228_p10 = pnand %p482_p6, %p227_p9 }
   0xe   : > { %p268_p11 = scmp.lt.s32.totalorder (!%p228_p10), %s625_s21, 1  ;;  %s264_s7 = sand.u32 (!%p228_p10), 1, %s617_s19  }
   0xf   : > { %231 = sbr.rel (%p228_p10) target bundleno = 168 (0xa8), region = 40  ;;  %s483_s8 = sshll.u32 (!%p228_p10), %s264_s7, 4 }
  0x10   : > { %s575_s27 = scalar_lea.hbm (!%p228_p10), %s780_s5, 32 }
  0x14   : > { %v289_v0 = vld [vmem:[%s777_s2] sm:$0xff]  ;;  %v635_v1 = vmov 0   ;;  %s269_s9 = scalar_select %p268_p11, %s625_s21, 1  ;;  %vm303_vm0 = vcmask 1043456   ;;  %vm299_vm1 = vcmask 31744  }
  0x15   : > { %554 = vset.pattern.permute.xlu0 %v635_v1  ;;  %v351_v3 = vld [vmem:[%s778_s3] sm:$0xff] }
  0x16   : > { %292 = vperm.xlu0 %554, %v289_v0   ;;  %s496_s10 = sshll.u32 %s269_s9, 3  ;;  %v288_v4 = vld [vmem:[%s776_s1] sm:$0xff]  ;;  %s486_s24 = sshll.u32 %s269_s9, 1 }
  0x17   : > { %s275_s13 = scalar_lea.vmem %s775_s0, %s496_s10  ;;  %s284_s29 = scalar_lea.vmem %s779_s4, %s486_s24 }
  0x18   : > { %v287_v2 = vld [vmem:[%s275_s13] sm:$0xff]  ;;  %s497_s10 = sshll.u32 %s625_s21, 4  ;;  %s266_s9 = scalar_lea.vmem [#allocation2], %s483_s8 }
  0x19   : > { %296 = vst [vmem:[#allocation1] ss:$2 sm:$0xff] %v287_v2  ;;  %v348_v7 = vld [vmem:[%s284_s29] sm:$0x3]  ;;  %s382_s13 = scalar_lea.hbm %s780_s5, %s497_s10  ;;  %s384_s14 = sshll.u32 %s266_s9, 4  ;;  %s385_s14 = int_to_ptr.vmem [resolvable:$true] %s384_s14 }
  0x1a   : > { %v349_v9 = vmul.f32 0.1, %v348_v7  ;;  %s386_s15 = sshll.u32 %s382_s13, 4  ;;  %s369_s21 = scalar_lea.sflag [#allocation3], %s264_s7  ;;  %s387_s15 = int_to_ptr.hbm [resolvable:$true] %s386_s15 }
  0x1b   : > { %s569_s16 = sshra.s32 %s387_s15, 4  ;;  %s570_s16 = int_to_ptr.hbm [resolvable:$true] %s569_s16 }
  0x1c   : > { %v350_v10 = vand.u32 2147483647, %v349_v9  ;;  %s571_s17 = scalar_lea.hbm %s570_s16, 16  ;;  %p576_p1 = scmp.lt.s32.totalorder %s570_s16, %s780_s5 }
  0x1d   : > { %p572_p12 = scmp.ne.s32.totalorder %s570_s16, %s571_s17  ;;  %p577_p2 = scmp.lt.s32.totalorder %s575_s27, %s571_s17 }
  0x1e   : > { %354 = vperm.xlu0 %554, %v351_v3   ;;  %v358_v11 = vperm.slane %v350_v10, 0  ;;  %v359_v12 = vperm.slane %v350_v10, 1 }
  0x1f   : > { %p573_p13 = pnand %p572_p12, %p706_p4  ;;  %p578_p3 = por %p577_p2, %p576_p1 }
  0x20   : > { %v297_v5 = vld.sshfl [vmem:[#allocation1] sm:$0xff pattern:$0x75316420]  ;;  %v298_v6 = vld.sshfl [vmem:[#allocation1 + $0x8] sm:$0xff pattern:$0x75316420] }
  0x21   : > { %487 = vmatpush.msk.msra.mxu0 %vm303_vm0, %v297_v5  ;;  %489 = vmatpush.msk.msra.mxu1 %vm303_vm0, %v298_v6  ;;  %p574_p0 = pneg %p573_p13 }
  0x22   : > { %488 = vmatmul.msk.f32.vlgmr.msra.gmra.mxu0 %vm299_vm1, %v288_v4  ;;  %490 = vmatmul.msk.f32.vlgmr.msra.gmra.mxu1 %vm299_vm1, %v288_v4 }
  0x23   : > { %p579_p5 = pnand %p578_p3, %p574_p0 }
  0x88   : > { %v293_v8 = vpop.permute.xlu0 %292 }
  0x90   : > { %v355_v13 = vpop.permute.xlu0 %354 }
  0x91   : > { %v362_v16 = vmul.f32 %v358_v11, %v355_v13  ;;  %v363_v17 = vmul.f32 %v359_v12, %v355_v13 }
  0x9f   : > { %v325_v14 = vpop.f32.mrf.mxu0  ;;  %v345_v15 = vpop.f32.mrf.mxu1 }
  0xa0   : > { %v326_v18 = vadd.f32 %v325_v14, %v293_v8  ;;  %v346_v19 = vadd.f32 %v345_v15, %v293_v8 }
  0xa2   : > { %v364_v20 = vadd.f32 %v362_v16, %v326_v18  ;;  %v365_v21 = vadd.f32 %v363_v17, %v346_v19 }
  0xa4   : > { %366 = vst [vmem:[%s266_s9] sm:$0xff] %v364_v20 }
  0xa5   : > { %367 = vst [vmem:[%s266_s9 + $0x8] sm:$0xff] %v365_v21 }
  0xa6   : > { %582 = shalt.err (!%p579_p5)
}
  0xa7   : > { %498 = dma.vmem_to_hbm [thread:$0]  (%p706_p4), %s385_s14, 256, %s387_s15, %s369_s21  }
  0xa8 PF: > { %p504_p6 = scmp.ge.s32.totalorder %s633_s23, 2  ;;  %s398_s7 = sand.u32 1, %s613_s18  }
  0xa9   : > { %s399_s10 = scalar_lea.sflag [#allocation3], %s398_s7 }
  0xaa   : > { %p501_p7 = pnand %p504_p6, %p713_p8 }
  0xac   : > { %p502_p9 = pneg %p501_p7 }
  0xae   : > { %608 = dma.done.wait (%p502_p9), %s399_s10, 256  }
  0xaf   : > { %610 = vsyncadd (%p502_p9), %s399_s10, 4294967040  ;;  %s18_s23 = sadd.s32 1, %s633_s23   ;;  %s783_s18 = smov %s617_s19 }
  0xb0   : > { %p15_p10 = scmp.ge.s32.totalorder %s18_s23, 4   ;;  %s784_s19 = smov %s621_s20 }
  0xb1   : > { %s785_s20 = smov %s719_s6  ;;  %s786_s21 = smov %s629_s22 }
  0xb2   : > { %s787_s22 = smov %s789_s26  ;;  %17 = sbr.rel (!%p15_p10) target bundleno = 4 (0x4), region = 78 }
  0xb7   :  { %405 = vsyncpa [#allocation3], 1 }
  0xb8   :  { %407 = vsyncpa [#allocation3 + $0x1], 1 }

</bundles_post_ra>
